<compile_context>
chip_gen: v7x
topology: tpu7x:2x2x1
jax: 0.10.0
libtpu: 0.0.40
codegen_flags: <defaults>
</compile_context>

<pallas_src>
import functools

import jax
import jax.numpy as jnp
from jax.experimental import pallas as pl
from jax.experimental.pallas import tpu as pltpu


_TARGET_BLOCK_BYTES = 6 * 1024 * 1024   # 4-8 MiB blocks saturate HBM BW
_MIN_GRID_STEPS = 8                     # >= 4 per TensorCore on v7x megacore


def _rmsnorm_kernel(x_ref, w_ref, o_ref, *, eps, hidden, use_mxu_reduce):
    # x_ref: (row_tile, hidden) in the input dtype; w_ref: (1, hidden) original dtype.
    x = x_ref[...]
    w = w_ref[...].astype(jnp.float32)
    if use_mxu_reduce:
        # Sub-32-bit path: square in native dtype (half-size temp), accumulate
        # the row sums on the MXU in f32 (vector-extended slot, VALU stays free).
        xx = x * x
        ones = jnp.ones((hidden, 1), dtype=xx.dtype)
        ss = jnp.dot(xx, ones, preferred_element_type=jnp.float32)  # (tile, 1)
        variance = ss * (1.0 / hidden)
    else:
        xf = x.astype(jnp.float32)
        variance = jnp.mean(xf * xf, axis=-1, keepdims=True)        # XLU reduce
    inv = jax.lax.rsqrt(variance + eps)                              # EUP slot
    # Final weight-mul fused with the down-cast.
    o_ref[...] = (w * (x.astype(jnp.float32) * inv)).astype(o_ref.dtype)


def _vmem_capacity_bytes() -> int:
    try:
        cap = int(pltpu.get_tpu_info().vmem_capacity_bytes)
    except Exception:
        cap = 64 * 1024 * 1024
    # Clamp to the per-TensorCore worst case (v7x = 64 MiB) so a per-chip
    # report can never make us oversubscribe a single core.
    return min(cap, 64 * 1024 * 1024)


def _round_up(x: int, m: int) -> int:
    return ((x + m - 1) // m) * m


def _pick_row_tile(rows: int, hidden: int, dtype_size: int) -> int:
    # Sublane packing multiple: 8 rows for 4-byte, 16 for 2-byte, 32 for 1-byte.
    m = max(8, 32 // dtype_size)
    row_bytes = max(hidden * dtype_size, 1)
    # Size the block to ~6 MiB: past that, bandwidth is flat and the
    # unoverlapped prologue/epilogue and VMEM pressure only grow.
    tile = max(m, (_TARGET_BLOCK_BYTES // row_bytes) // m * m)
    # Keep >= _MIN_GRID_STEPS grid steps when the input is big enough, so each
    # TensorCore (v7x has 2, sharded by the "parallel" axis) pipelines several
    # blocks and the per-block compute tail hides under the next block's DMA.
    if rows >= _MIN_GRID_STEPS * m:
        tile = min(tile, _round_up(pl.cdiv(rows, _MIN_GRID_STEPS), m))
    tile = min(tile, _round_up(rows, m))
    return max(m, tile)


def _vmem_limit_bytes(row_tile: int, hidden: int, dsize: int) -> int:
    block = row_tile * hidden * dsize
    # 2x double-buffered input + 2x double-buffered output + generous f32 temps
    # (x_f32, x*x / normalized product, broadcast weight product) + weight bufs.
    est = 2 * block + 2 * block + 3 * row_tile * hidden * 4
    est += 2 * hidden * dsize + hidden * 4 + (1 << 20)
    est = int(est * 1.25)                     # ~25% headroom for Mosaic temps
    est = max(est, 16 * 1024 * 1024)
    return min(est, int(_vmem_capacity_bytes() * 0.9))


def llama_rmsnorm(hidden_states: jax.Array, weight: jax.Array,
                  eps: float = 1e-6, row_tile: int | None = None) -> jax.Array:
    """RMSNorm over the last axis, matching LlamaRMSNorm.forward semantics."""
    orig_shape = hidden_states.shape
    orig_dtype = hidden_states.dtype
    hidden = orig_shape[-1]
    rows = 1
    for d in orig_shape[:-1]:
        rows *= d

    dsize = jnp.dtype(orig_dtype).itemsize
    if row_tile is None:
        row_tile = _pick_row_tile(rows, hidden, dsize)

    x2d = hidden_states.reshape(rows, hidden)
    w2d = weight.reshape(1, hidden)            # original dtype; cast in-kernel

    # MXU reduction only where it pays off and lowers robustly:
    # sub-32-bit activations with a lane-aligned hidden size.
    use_mxu_reduce = (dsize < 4) and (hidden % 128 == 0) and (hidden >= 128)

    grid = (pl.cdiv(rows, row_tile),)
    vmem_limit = _vmem_limit_bytes(row_tile, hidden, dsize)

    out = pl.pallas_call(
        functools.partial(_rmsnorm_kernel, eps=eps, hidden=hidden,
                          use_mxu_reduce=use_mxu_reduce),
        out_shape=jax.ShapeDtypeStruct((rows, hidden), orig_dtype),
        grid_spec=pltpu.PrefetchScalarGridSpec(
            num_scalar_prefetch=0,
            grid=grid,
            in_specs=[
                pl.BlockSpec((row_tile, hidden), lambda i: (i, 0)),
                pl.BlockSpec((1, hidden), lambda i: (0, 0)),  # weight stays resident
            ],
            out_specs=pl.BlockSpec((row_tile, hidden), lambda i: (i, 0)),
        ),
        compiler_params=pltpu.CompilerParams(
            dimension_semantics=("parallel",),
            vmem_limit_bytes=int(vmem_limit),
        ),
    )(x2d, w2d)

    return out.reshape(orig_shape)


def llama_rmsnorm_reference(hidden_states, weight, eps=1e-6):
    input_dtype = hidden_states.dtype
    x = hidden_states.astype(jnp.float32)
    variance = jnp.mean(x * x, axis=-1, keepdims=True)
    x = x * jax.lax.rsqrt(variance + eps)
    return (weight.astype(jnp.float32) * x).astype(input_dtype)


if __name__ == "__main__":
    batch, seq, hidden = 2, 8, 32
    eps = 1e-6

    key = jax.random.PRNGKey(0)
    x = jax.random.normal(key, (batch, seq, hidden), dtype=jnp.float32)
    # Matches nn.Parameter(torch.ones(hidden_size))
    weight = jnp.ones((hidden,), dtype=jnp.float32)

    out = llama_rmsnorm(x, weight, eps=eps)
    out = jax.block_until_ready(out)

    ref = llama_rmsnorm_reference(x, weight, eps=eps)
    assert out.shape == x.shape and out.dtype == x.dtype
    assert jnp.allclose(out, ref, atol=1e-5, rtol=1e-5), "mismatch vs reference"

    # Exercise a ragged row count (rows not divisible by row_tile) to validate
    # masked OOB handling on the last block.
    x2 = jax.random.normal(jax.random.PRNGKey(1), (3, 5, hidden), dtype=jnp.float32)
    out2 = jax.block_until_ready(llama_rmsnorm(x2, weight, eps=eps, row_tile=8))
    ref2 = llama_rmsnorm_reference(x2, weight, eps=eps)
    assert jnp.allclose(out2, ref2, atol=1e-5, rtol=1e-5), "ragged mismatch"

    print("KERNEL_OK")
</pallas_src>

<mosaic_0001>
module attributes {stable_mosaic.version = 11 : i64} {
  func.func @_rmsnorm_kernel(%arg0: i32, %arg1: memref<16x32xf32, #tpu.memory_space<vmem>>, %arg2: memref<1x32xf32, #tpu.memory_space<vmem>>, %arg3: memref<16x32xf32, #tpu.memory_space<vmem>>) attributes {dimension_semantics = [#tpu.dimension_semantics<parallel>], iteration_bounds = array<i64: 1>, scalar_prefetch = 0 : i64, scratch_operands = 0 : i64, tpu.core_type = #tpu.core_type<tc>, window_params = [{transform_indices = @transform_0, window_bounds = array<i64: 16, 32>}, {pipeline_mode = #tpu.pipeline_mode<synchronous>, transform_indices = @transform_1, window_bounds = array<i64: 1, 32>}, {transform_indices = @transform_2, window_bounds = array<i64: 16, 32>}]} {
    %c0 = arith.constant 0 : index
    %c0_0 = arith.constant 0 : index
    %0 = vector.load %arg1[%c0, %c0_0] : memref<16x32xf32, #tpu.memory_space<vmem>>, vector<16x32xf32>
    %c0_1 = arith.constant 0 : index
    %c0_2 = arith.constant 0 : index
    %1 = vector.load %arg2[%c0_1, %c0_2] : memref<1x32xf32, #tpu.memory_space<vmem>>, vector<1x32xf32>
    %2 = arith.mulf %0, %0 : vector<16x32xf32>
    %cst = arith.constant dense<0.000000e+00> : vector<16xf32>
    %3 = vector.multi_reduction <add>, %2, %cst [1] : vector<16x32xf32> to vector<16xf32>
    %4 = vector.shape_cast %3 : vector<16xf32> to vector<16x1xf32>
    %cst_3 = arith.constant 3.200000e+01 : f32
    %5 = vector.broadcast %cst_3 : f32 to vector<16x1xf32>
    %6 = arith.divf %4, %5 : vector<16x1xf32>
    %cst_4 = arith.constant 9.99999997E-7 : f32
    %7 = vector.broadcast %cst_4 : f32 to vector<16x1xf32>
    %8 = arith.addf %6, %7 : vector<16x1xf32>
    %9 = math.rsqrt %8 : vector<16x1xf32>
    %10 = vector.broadcast %9 : vector<16x1xf32> to vector<16x32xf32>
    %11 = arith.mulf %0, %10 : vector<16x32xf32>
    %12 = vector.broadcast %1 : vector<1x32xf32> to vector<16x32xf32>
    %13 = arith.mulf %12, %11 : vector<16x32xf32>
    %c0_5 = arith.constant 0 : index
    %c0_6 = arith.constant 0 : index
    %14 = vector.load %arg3[%c0_5, %c0_6] : memref<16x32xf32, #tpu.memory_space<vmem>>, vector<16x32xf32>
    tpu.vector_store %arg3[%c0_5, %c0_6], %13 {strides = array<i32>} : memref<16x32xf32, #tpu.memory_space<vmem>>, vector<16x32xf32>,
    return
  }
  func.func @transform_0(%arg0: i32) -> (i32, i32) {
    %c0_i32 = arith.constant 0 : i32
    %c0_i32_0 = arith.constant 0 : i32
    return %arg0, %c0_i32 : i32, i32
  }
  func.func @transform_1(%arg0: i32) -> (i32, i32) {
    %c0_i32 = arith.constant 0 : i32
    %c0_i32_0 = arith.constant 0 : i32
    %c0_i32_1 = arith.constant 0 : i32
    return %c0_i32, %c0_i32_0 : i32, i32
  }
  func.func @transform_2(%arg0: i32) -> (i32, i32) {
    %c0_i32 = arith.constant 0 : i32
    %c0_i32_0 = arith.constant 0 : i32
    return %arg0, %c0_i32 : i32, i32
  }
}

</mosaic_0001>

<bundles_post_ra>
// kernel: tpu_custom_call.1
= control target key start
LH: loop header
LB: loop body
LE: loop exit
PB: predicated region body
PF: predicated region fallthrough
CT: control target
= control target key end

     0   :  { %7 = vsyncpa [#allocation3], 0  ;;  %s187_s0 = inlined_call_operand.hbm [shape: f32[16,32], index: 0, kind: input, shape index: {}]   ;;  %s188_s1 = inlined_call_operand.vmem [shape: f32[1,32], index: 1, kind: input, shape index: {}]   ;;  %s189_s2 = inlined_call_operand.hbm [shape: f32[16,32], index: 2, kind: output, shape index: {}]  }
   0x1   :  { %8 = vsyncpa [#allocation4], 0  ;;  %s131_s9 = smov [#allocation2]   ;;  %s83_s13 = scalar_lea.hbm %s187_s0, 256 }
   0x2   :  { %s14_s10 = sshll.u32 %s131_s9, 4  ;;  %p84_p0 = scmp.ne.s32.totalorder %s187_s0, %s83_s13  ;;  %s15_s10 = int_to_ptr.vmem [resolvable:$true] %s14_s10 }
   0x3   :  { %p87_p1 = scmp.lt.u32.totalorder %s83_s13, %s187_s0 }
   0x5   :  { %p89_p2 = pnand %p87_p1, %p84_p0 }
   0x7   :  { %92 = shalt.err (!%p89_p2)
}
   0x8   :  { %s93_s18 = scalar_lea.vmem %s15_s10, 256  ;;  %p98_p4 = scmp.lt.s32.totalorder %s15_s10, %s15_s10 }
   0x9   :  { %p94_p3 = scmp.ne.s32.totalorder %s15_s10, %s93_s18  ;;  %p99_p5 = scmp.lt.s32.totalorder %s93_s18, %s93_s18 }
   0xb   :  { %p100_p6 = por %p99_p5, %p98_p4 }
   0xd   :  { %p101_p7 = pnand %p100_p6, %p94_p3 }
   0xf   :  { %104 = shalt.err (!%p101_p7)
}
  0x10   :  { %s132_s19 = smov 128   ;;  %s133_s20 = smov 8  }
  0x11   :  { %20 = dma.hbm_to_vmem [thread:$0]  %s187_s0, 256, %s15_s10, [#allocation3], %s132_s19, %s132_s19, %s133_s20  }
  0x12   :  { %127 = dma.done.wait [#allocation3], 256  }
  0x13   :  { %128 = vsyncadd [#allocation3], 4294967040  ;;  %v26_v0 = vld [vmem:[#allocation2] sm:$0xff]  ;;  %vm31_vm0 = vcmask 261120   ;;  %v27_v1 = vld [vmem:[#allocation2 + $0x8] sm:$0xff]  ;;  %s134_s24 = smov [#allocation5]  }
  0x14   :  { %v29_v2 = vmul.f32 %v26_v0, %v26_v0  ;;  %v30_v3 = vmul.f32 %v27_v1, %v27_v1  ;;  %v74_v13 = vld [vmem:[%s188_s1] ss:$0 sm:$0xff]  ;;  %s62_s25 = sshll.u32 %s134_s24, 4  ;;  %s63_s25 = int_to_ptr.vmem [resolvable:$true] %s62_s25 }
  0x15   :  { %s105_s26 = scalar_lea.vmem %s63_s25, 256  ;;  %p110_p9 = scmp.lt.s32.totalorder %s63_s25, %s63_s25 }
  0x16   :  { %v32_v4 = vsel %vm31_vm0, %v29_v2, 0.0  ;;  %v35_v5 = vsel %vm31_vm0, %v30_v3, 0.0  ;;  %p106_p8 = scmp.ne.s32.totalorder %s63_s25, %s105_s26  ;;  %p111_p10 = scmp.lt.s32.totalorder %s105_s26, %s105_s26 }
  0x17   :  { %33 = vadd.xlane.f32.xlu0 %v32_v4 }
  0x18   :  { %p112_p11 = por %p111_p10, %p110_p9 }
  0x1a   :  { %p113_p12 = pnand %p112_p11, %p106_p8 }
  0x1b   :  { %36 = vadd.xlane.f32.xlu0 %v35_v5 }
  0xa4   :  { %v34_v6 = vpop.xlane.xlu0 %33 }
  0xa5   :  { %v39_v7 = vmul.f32 0.03125, %v34_v6 }
  0xa7   :  { %v41_v8 = vadd.f32 1e-06, %v39_v7 }
  0xa8   :  { %v37_v9 = vpop.xlane.xlu0 %36 }
  0xa9   :  { %79 = vrsqrt.f32 %v41_v8  ;;  %v40_v10 = vmul.f32 0.03125, %v37_v9 }
  0xab   :  { %v42_v11 = vadd.f32 1e-06, %v40_v10 }
  0xad   :  { %81 = vrsqrt.f32 %v42_v11 }
  0xb3   :  { %v80_v12 = vpop.eup %79 }
  0xb4   :  { %v45_v14 = vmul.f32 %v80_v12, %v26_v0 }
  0xb6   :  { %v53_v15 = vmul.f32 %v74_v13, %v45_v14 }
  0xb7   :  { %v82_v16 = vpop.eup %81 }
  0xb8   :  { %v46_v17 = vmul.f32 %v82_v16, %v27_v1  ;;  %55 = vst.msk [vmem:[#allocation5] sm:$0xff] %vm31_vm0, %v53_v15 }
  0xba   :  { %v54_v18 = vmul.f32 %v74_v13, %v46_v17 }
  0xbc   :  { %56 = vst.msk [vmem:[#allocation5 + $0x8] sm:$0xff] %vm31_vm0, %v54_v18 }
  0xbd   :  { %116 = shalt.err (!%p113_p12)
}
  0xbe   :  { %s117_s28 = scalar_lea.hbm %s189_s2, 256 }
  0xbf   :  { %p118_p13 = scmp.ne.s32.totalorder %s189_s2, %s117_s28  ;;  %p121_p0 = scmp.lt.u32.totalorder %s117_s28, %s189_s2 }
  0xc1   :  { %p123_p1 = pnand %p121_p0, %p118_p13 }
  0xc3   :  { %126 = shalt.err (!%p123_p1)
}
  0xc4   :  { %68 = dma.vmem_to_hbm [thread:$0]  %s63_s25, 256, %s189_s2, [#allocation4], %s132_s19, %s132_s19, %s133_s20  }
  0xc5   :  { %129 = dma.done.wait [#allocation4], 256  }
  0xc6   :  { %130 = vsyncadd [#allocation4], 4294967040 }
  0xc7   :  { %72 = vsyncpa [#allocation3], 1 }
  0xc8   :  { %73 = vsyncpa [#allocation4], 1 }

</bundles_post_ra>
